<compile_context>
chip_gen: v7x
topology: tpu7x:2x2x1
jax: 0.10.0
libtpu: 0.0.40
codegen_flags: <defaults>
</compile_context>

<pallas_src>
import jax
import jax.numpy as jnp
from jax.experimental import pallas as pl
from jax.experimental.pallas import tpu as pltpu

INPUT_SIZE = 2
HIDDEN_SIZE = 32
OUTPUT_SIZE = 1

_BM_CAP = 16384  # lane-dense tile cap: each (32, 16384) f32 intermediate ~= 2 MiB


def make_mlp_kernel(tanh_bf16: bool):
    def mlp_kernel(x_ref, w1_ref, b1_ref, w2_ref, b2_ref, w3_ref, b3_ref, o_ref):
        """Feature-major MLP tile.

        x_ref : (INPUT_SIZE,  bm)   batch on lanes (lane-dense)
        w1    : (HIDDEN, INPUT)     PyTorch [out, in] layout
        b1    : (HIDDEN, 1)
        w2    : (HIDDEN, HIDDEN)
        b2    : (HIDDEN, 1)
        w3    : (HIDDEN, 1)         == torch W3.T, broadcasts over lanes
        b3    : (1, 1)
        o_ref : (1, bm)             lane-dense output row
        """
        def act(v):
            if tanh_bf16:
                # v6e/v7x only: bf16 EUP ~2x tanh throughput (never use on v5e).
                return jnp.tanh(v.astype(jnp.bfloat16)).astype(jnp.float32)
            return jnp.tanh(v)

        x = x_ref[...]
        w1 = w1_ref[...]
        # Layer 1: K=2 contraction -> plain VPU FMAs (skip the MXU entirely).
        h = w1[:, 0:1] * x[0:1, :] + w1[:, 1:2] * x[1:2, :] + b1_ref[...]
        h = act(h)                                            # (32, bm) dense vregs
        # Layer 2: the only real matmul (32x32) -> MXU, full f32 accumulation.
        h = jnp.dot(w2_ref[...], h,
                    preferred_element_type=jnp.float32,
                    precision=jax.lax.Precision.HIGHEST) + b2_ref[...]
        h = act(h)
        # Layer 3: single output feature -> broadcast-mul + cross-sublane reduce (XLU).
        out = jnp.sum(w3_ref[...] * h, axis=0, keepdims=True) + b3_ref[...]
        o_ref[...] = out.astype(o_ref.dtype)

    return mlp_kernel


def _round_up(n, m):
    return -(-n // m) * m


def _cdiv(a, b):
    return -(-a // b)


def _num_tensorcores():
    """Best-effort TensorCores-per-chip (v7x = 2, v5e/v6e = 1)."""
    try:
        dev = jax.devices()[0]
    except Exception:
        return 1
    n = getattr(dev, "num_cores", None)
    if isinstance(n, int) and n >= 1:
        return n
    kind = str(getattr(dev, "device_kind", "")).lower()
    return 2 if "v7" in kind else 1


def _choose_tiling(B, num_cores):
    """Pick (bm, Bp): lane-dense (x128) batch tile and padded batch extent."""
    bp_min = _round_up(max(B, 1), 128)
    if num_cores <= 1:
        # Single TensorCore (v5e/v6e): the grid is a serial loop -> as few, fat
        # steps as possible (ideally exactly one).
        bm = min(_BM_CAP, bp_min)
    else:
        # v7x: split into a core-count multiple of equal tiles so both TCs are
        # loaded under dimension_semantics=("parallel",).
        n = max(num_cores, _cdiv(bp_min, _BM_CAP))
        n = _round_up(n, num_cores)
        bm = _round_up(_cdiv(bp_min, n), 128)
    bp = _round_up(bp_min, bm)
    return bm, bp


def mlp_forward(x, params, *, bm=None, tanh_bf16=False):
    """x: [B, INPUT_SIZE] float32. Returns [B, OUTPUT_SIZE] float32 (== torch MLP.forward)."""
    w1, b1, w2, b2, w3t, b3 = params
    B = x.shape[0]

    if bm is None:
        bm, Bp = _choose_tiling(B, _num_tensorcores())
    else:
        assert bm % 128 == 0, "batch tile must be a multiple of 128 (lane width)"
        Bp = _round_up(B, bm)

    # Feature-major (batch-on-lanes) input; pad only the ragged lane tail.
    xt = jnp.transpose(x.astype(jnp.float32))                 # (INPUT_SIZE, B)
    if Bp != B:
        xt = jnp.pad(xt, ((0, 0), (0, Bp - B)))

    grid = (Bp // bm,)
    in_specs = [
        pl.BlockSpec((INPUT_SIZE, bm), lambda i: (0, i)),            # x tile
        pl.BlockSpec((HIDDEN_SIZE, INPUT_SIZE), lambda i: (0, 0)),   # w1 (resident)
        pl.BlockSpec((HIDDEN_SIZE, 1), lambda i: (0, 0)),            # b1
        pl.BlockSpec((HIDDEN_SIZE, HIDDEN_SIZE), lambda i: (0, 0)),  # w2
        pl.BlockSpec((HIDDEN_SIZE, 1), lambda i: (0, 0)),            # b2
        pl.BlockSpec((HIDDEN_SIZE, 1), lambda i: (0, 0)),            # w3 (as column)
        pl.BlockSpec((1, 1), lambda i: (0, 0)),                      # b3
    ]
    out_spec = pl.BlockSpec((1, bm), lambda i: (0, i))               # lane-dense row

    out_t = pl.pallas_call(
        make_mlp_kernel(tanh_bf16),
        out_shape=jax.ShapeDtypeStruct((1, Bp), jnp.float32),
        grid_spec=pltpu.PrefetchScalarGridSpec(
            num_scalar_prefetch=0,
            grid=grid,
            in_specs=in_specs,
            out_specs=out_spec,
        ),
        compiler_params=pltpu.CompilerParams(
            dimension_semantics=("parallel",),   # shard batch tiles across TCs (v7x)
            vmem_limit_bytes=32 * 1024 * 1024,   # explicit, safe on v5e/v6e/v7x
        ),
    )(xt, w1, b1, w2, b2, w3t, b3)

    return out_t[:, :B].reshape(B, OUTPUT_SIZE)


def init_params(key):
    """PyTorch nn.Linear layout (W: [out, in], y = x @ W.T + b), stored in the
    shapes the feature-major kernel consumes: biases as [out, 1], w3 as [in, 1]."""
    ks = jax.random.split(key, 6)

    def linear(kw, kb, fan_in, fan_out):
        bound = 1.0 / jnp.sqrt(jnp.float32(fan_in))
        w = jax.random.uniform(kw, (fan_out, fan_in), jnp.float32, -bound, bound)
        b = jax.random.uniform(kb, (fan_out, 1), jnp.float32, -bound, bound)
        return w, b

    w1, b1 = linear(ks[0], ks[1], INPUT_SIZE, HIDDEN_SIZE)    # (32, 2),  (32, 1)
    w2, b2 = linear(ks[2], ks[3], HIDDEN_SIZE, HIDDEN_SIZE)   # (32, 32), (32, 1)
    w3, b3 = linear(ks[4], ks[5], HIDDEN_SIZE, OUTPUT_SIZE)   # (1, 32),  (1, 1)
    return (w1, b1, w2, b2, w3.T, b3)                         # w3.T -> (32, 1)


def mlp_reference(x, params):
    w1, b1, w2, b2, w3t, b3 = params
    h = jnp.tanh(x @ w1.T + b1.T)
    h = jnp.tanh(h @ w2.T + b2.T)
    return h @ w3t + b3.T


if __name__ == "__main__":
    key = jax.random.PRNGKey(0)
    k_params, k_x = jax.random.split(key)

    params = init_params(k_params)
    fwd = jax.jit(mlp_forward, static_argnames=("bm", "tanh_bf16"))

    # Small batch, consistent with the module's [B, input_size=2] input.
    B = 256
    x = jax.random.normal(k_x, (B, INPUT_SIZE), jnp.float32)
    out = jax.block_until_ready(fwd(x, params))
    ref = mlp_reference(x, params)
    assert out.shape == (B, OUTPUT_SIZE)
    assert jnp.allclose(out, ref, atol=1e-5, rtol=1e-5), "mismatch vs reference (B=256)"

    # Ragged batch exercises the lane-tail padding path.
    B2 = 200
    x2 = jax.random.normal(k_x, (B2, INPUT_SIZE), jnp.float32)
    out2 = jax.block_until_ready(fwd(x2, params))
    ref2 = mlp_reference(x2, params)
    assert out2.shape == (B2, OUTPUT_SIZE)
    assert jnp.allclose(out2, ref2, atol=1e-5, rtol=1e-5), "mismatch vs reference (B=200)"

    print("KERNEL_OK")
</pallas_src>

<mosaic_0001>
module attributes {stable_mosaic.version = 11 : i64} {
  func.func @mlp_kernel(%arg0: i32, %arg1: memref<2x256xf32, #tpu.memory_space<vmem>>, %arg2: memref<32x2xf32, #tpu.memory_space<vmem>>, %arg3: memref<32x1xf32, #tpu.memory_space<vmem>>, %arg4: memref<32x32xf32, #tpu.memory_space<vmem>>, %arg5: memref<32x1xf32, #tpu.memory_space<vmem>>, %arg6: memref<32x1xf32, #tpu.memory_space<vmem>>, %arg7: memref<1x1xf32, #tpu.memory_space<vmem>>, %arg8: memref<1x256xf32, #tpu.memory_space<vmem>>) attributes {dimension_semantics = [#tpu.dimension_semantics<parallel>], iteration_bounds = array<i64: 1>, scalar_prefetch = 0 : i64, scratch_operands = 0 : i64, tpu.core_type = #tpu.core_type<tc>, window_params = [{transform_indices = @transform_0, window_bounds = array<i64: 2, 256>}, {pipeline_mode = #tpu.pipeline_mode<synchronous>, transform_indices = @transform_1, window_bounds = array<i64: 32, 2>}, {pipeline_mode = #tpu.pipeline_mode<synchronous>, transform_indices = @transform_2, window_bounds = array<i64: 32, 1>}, {pipeline_mode = #tpu.pipeline_mode<synchronous>, transform_indices = @transform_3, window_bounds = array<i64: 32, 32>}, {pipeline_mode = #tpu.pipeline_mode<synchronous>, transform_indices = @transform_4, window_bounds = array<i64: 32, 1>}, {pipeline_mode = #tpu.pipeline_mode<synchronous>, transform_indices = @transform_5, window_bounds = array<i64: 32, 1>}, {pipeline_mode = #tpu.pipeline_mode<synchronous>, transform_indices = @transform_6, window_bounds = array<i64: 1, 1>}, {transform_indices = @transform_7, window_bounds = array<i64: 1, 256>}]} {
    %c0 = arith.constant 0 : index
    %c0_0 = arith.constant 0 : index
    %0 = vector.load %arg1[%c0, %c0_0] : memref<2x256xf32, #tpu.memory_space<vmem>>, vector<2x256xf32>
    %c0_1 = arith.constant 0 : index
    %c0_2 = arith.constant 0 : index
    %1 = vector.load %arg2[%c0_1, %c0_2] : memref<32x2xf32, #tpu.memory_space<vmem>>, vector<32x2xf32>
    %2 = vector.extract_strided_slice %1 {offsets = [0, 0], sizes = [32, 1], strides = [1, 1]} : vector<32x2xf32> to vector<32x1xf32>
    %3 = vector.extract_strided_slice %0 {offsets = [0, 0], sizes = [1, 256], strides = [1, 1]} : vector<2x256xf32> to vector<1x256xf32>
    %4 = vector.broadcast %2 : vector<32x1xf32> to vector<32x256xf32>
    %5 = vector.broadcast %3 : vector<1x256xf32> to vector<32x256xf32>
    %6 = arith.mulf %4, %5 : vector<32x256xf32>
    %7 = vector.extract_strided_slice %1 {offsets = [0, 1], sizes = [32, 1], strides = [1, 1]} : vector<32x2xf32> to vector<32x1xf32>
    %8 = vector.extract_strided_slice %0 {offsets = [1, 0], sizes = [1, 256], strides = [1, 1]} : vector<2x256xf32> to vector<1x256xf32>
    %9 = vector.broadcast %7 : vector<32x1xf32> to vector<32x256xf32>
    %10 = vector.broadcast %8 : vector<1x256xf32> to vector<32x256xf32>
    %11 = arith.mulf %9, %10 : vector<32x256xf32>
    %12 = arith.addf %6, %11 : vector<32x256xf32>
    %c0_3 = arith.constant 0 : index
    %c0_4 = arith.constant 0 : index
    %13 = vector.load %arg3[%c0_3, %c0_4] : memref<32x1xf32, #tpu.memory_space<vmem>>, vector<32x1xf32>
    %14 = vector.broadcast %13 : vector<32x1xf32> to vector<32x256xf32>
    %15 = arith.addf %12, %14 : vector<32x256xf32>
    %16 = math.tanh %15 : vector<32x256xf32>
    %c0_5 = arith.constant 0 : index
    %c0_6 = arith.constant 0 : index
    %17 = vector.load %arg4[%c0_5, %c0_6] : memref<32x32xf32, #tpu.memory_space<vmem>>, vector<32x32xf32>
    %cst = arith.constant dense<0.000000e+00> : vector<32x256xf32>
    %18 = tpu.matmul %17, %16, %cst {dimension_numbers = #tpu.dot_dimension_numbers<[1], [0], [0], [1], [0, 0, 1, 1], [], []>, precision = #tpu.contract_precision<fp32>} : vector<32x32xf32>, vector<32x256xf32>, vector<32x256xf32> -> vector<32x256xf32>
    %c0_7 = arith.constant 0 : index
    %c0_8 = arith.constant 0 : index
    %19 = vector.load %arg5[%c0_7, %c0_8] : memref<32x1xf32, #tpu.memory_space<vmem>>, vector<32x1xf32>
    %20 = vector.broadcast %19 : vector<32x1xf32> to vector<32x256xf32>
    %21 = arith.addf %18, %20 : vector<32x256xf32>
    %22 = math.tanh %21 : vector<32x256xf32>
    %c0_9 = arith.constant 0 : index
    %c0_10 = arith.constant 0 : index
    %23 = vector.load %arg6[%c0_9, %c0_10] : memref<32x1xf32, #tpu.memory_space<vmem>>, vector<32x1xf32>
    %24 = vector.broadcast %23 : vector<32x1xf32> to vector<32x256xf32>
    %25 = arith.mulf %24, %22 : vector<32x256xf32>
    %cst_11 = arith.constant dense<0.000000e+00> : vector<256xf32>
    %26 = vector.multi_reduction <add>, %25, %cst_11 [0] : vector<32x256xf32> to vector<256xf32>
    %27 = vector.shape_cast %26 : vector<256xf32> to vector<1x256xf32>
    %c0_12 = arith.constant 0 : index
    %c0_13 = arith.constant 0 : index
    %28 = vector.load %arg7[%c0_12, %c0_13] : memref<1x1xf32, #tpu.memory_space<vmem>>, vector<1x1xf32>
    %29 = vector.broadcast %28 : vector<1x1xf32> to vector<1x256xf32>
    %30 = arith.addf %27, %29 : vector<1x256xf32>
    %c0_14 = arith.constant 0 : index
    %c0_15 = arith.constant 0 : index
    %31 = vector.load %arg8[%c0_14, %c0_15] : memref<1x256xf32, #tpu.memory_space<vmem>>, vector<1x256xf32>
    tpu.vector_store %arg8[%c0_14, %c0_15], %30 {strides = array<i32>} : memref<1x256xf32, #tpu.memory_space<vmem>>, vector<1x256xf32>,
    return
  }
  func.func @transform_0(%arg0: i32) -> (i32, i32) {
    %c0_i32 = arith.constant 0 : i32
    %c0_i32_0 = arith.constant 0 : i32
    return %c0_i32, %arg0 : i32, i32
  }
  func.func @transform_1(%arg0: i32) -> (i32, i32) {
    %c0_i32 = arith.constant 0 : i32
    %c0_i32_0 = arith.constant 0 : i32
    %c0_i32_1 = arith.constant 0 : i32
    return %c0_i32, %c0_i32_0 : i32, i32
  }
  func.func @transform_2(%arg0: i32) -> (i32, i32) {
    %c0_i32 = arith.constant 0 : i32
    %c0_i32_0 = arith.constant 0 : i32
    %c0_i32_1 = arith.constant 0 : i32
    return %c0_i32, %c0_i32_0 : i32, i32
  }
  func.func @transform_3(%arg0: i32) -> (i32, i32) {
    %c0_i32 = arith.constant 0 : i32
    %c0_i32_0 = arith.constant 0 : i32
    %c0_i32_1 = arith.constant 0 : i32
    return %c0_i32, %c0_i32_0 : i32, i32
  }
  func.func @transform_4(%arg0: i32) -> (i32, i32) {
    %c0_i32 = arith.constant 0 : i32
    %c0_i32_0 = arith.constant 0 : i32
    %c0_i32_1 = arith.constant 0 : i32
    return %c0_i32, %c0_i32_0 : i32, i32
  }
  func.func @transform_5(%arg0: i32) -> (i32, i32) {
    %c0_i32 = arith.constant 0 : i32
    %c0_i32_0 = arith.constant 0 : i32
    %c0_i32_1 = arith.constant 0 : i32
    return %c0_i32, %c0_i32_0 : i32, i32
  }
  func.func @transform_6(%arg0: i32) -> (i32, i32) {
    %c0_i32 = arith.constant 0 : i32
    %c0_i32_0 = arith.constant 0 : i32
    %c0_i32_1 = arith.constant 0 : i32
    return %c0_i32, %c0_i32_0 : i32, i32
  }
  func.func @transform_7(%arg0: i32) -> (i32, i32) {
    %c0_i32 = arith.constant 0 : i32
    %c0_i32_0 = arith.constant 0 : i32
    return %c0_i32, %arg0 : i32, i32
  }
}

</mosaic_0001>

<bundles_post_ra>
// kernel: mlp_forward.1
= control target key start
LH: loop header
LB: loop body
LE: loop exit
PB: predicated region body
PF: predicated region fallthrough
CT: control target
= control target key end

     0   :  { %s1450_s0 = inlined_call_operand.vmem [shape: f32[2,256], index: 0, kind: input, shape index: {}]   ;;  %s1451_s1 = inlined_call_operand.vmem [shape: f32[32,2], index: 1, kind: input, shape index: {}]   ;;  %s1452_s2 = inlined_call_operand.vmem [shape: f32[32,1], index: 2, kind: input, shape index: {}]   ;;  %s1453_s3 = inlined_call_operand.vmem [shape: f32[32,32], index: 3, kind: input, shape index: {}]   ;;  %s1454_s4 = inlined_call_operand.vmem [shape: f32[32,1], index: 4, kind: input, shape index: {}]   ;;  %s1455_s5 = inlined_call_operand.vmem [shape: f32[32,1], index: 5, kind: input, shape index: {}]   ;;  %s1456_s6 = inlined_call_operand.<no memory space> [shape: f32[1,1], index: 6, kind: input, shape index: {}]   ;;  %s1457_s7 = inlined_call_operand.hbm [shape: f32[1,256], index: 7, kind: output, shape index: {}]  }
   0x1   :  { %v12_v0 = vstv %s1456_s6 }
   0x2   :  { %13 = vst [vmem:[#allocation2] sm:$0x1] %v12_v0 }
   0x3   :  { %v32_v1 = vld [vmem:[%s1451_s1 + $0x10] sm:$0xff]  ;;  %v30_v2 = vld [vmem:[%s1451_s1] sm:$0xff]  ;;  %v1172_v3 = vmov 1   ;;  %v31_v4 = vld [vmem:[%s1451_s1 + $0x8] sm:$0xff]  ;;  %v1173_v5 = vmov 0  }
   0x4   :  { %1112 = vset.pattern.permute.xlu0 %v1172_v3  ;;  %1110 = vset.pattern.permute.xlu1 %v1172_v3 }
   0x5   :  { %90 = vperm.xlu0 %1112, %v32_v1   ;;  %82 = vperm.xlu1 %1110, %v30_v2  }
   0x9   :  { %1113 = vset.pattern.permute.xlu0 %v1173_v5  ;;  %86 = vperm.xlu1 %1110, %v31_v4  }
   0xa   :  { %14 = vsyncpa [#allocation4], 0  ;;  %36 = vperm.xlu0 %1113, %v30_v2   ;;  %v33_v6 = vld [vmem:[%s1451_s1 + $0x18] sm:$0xff]  ;;  %v132_v7 = vld [vmem:[%s1452_s2 + $0x8] sm:$0xff]  ;;  %v1174_v20 = vmov 0.0   ;;  %v55_v21 = vlaneseq  ;;  %vm199_vm0 = vcmask 261120  }
   0xb   :  { %v131_v8 = vld [vmem:[%s1452_s2] sm:$0xff]  ;;  %v133_v10 = vld [vmem:[%s1452_s2 + $0x10] sm:$0xff]  ;;  %v134_v12 = vld [vmem:[%s1452_s2 + $0x18] sm:$0xff]  ;;  %284 = vmatprep.mubr.f32.mxu1 %v1174_v20  ;;  %647 = vmatprep.mubr.f32.mxu0 %v1174_v20 }
   0xc   :  { %v175_v9 = vld [vmem:[%s1454_s4] sm:$0xff]  ;;  %v177_v11 = vld [vmem:[%s1454_s4 + $0x10] sm:$0xff]  ;;  %v176_v14 = vld [vmem:[%s1454_s4 + $0x8] sm:$0xff]  ;;  %v1271_v22 = vshrl.u32 %v55_v21, 7  ;;  %vm992_vm1 = vcmp.lt.s32.totalorder %v55_v21, 256 }
   0xd   :  { %1111 = vset.pattern.permute.xlu1 %v1173_v5  ;;  %v910_v13 = vld [vmem:[%s1455_s5] sm:$0xff]  ;;  %v912_v15 = vld [vmem:[%s1455_s5 + $0x10] sm:$0xff]  ;;  %v178_v16 = vld [vmem:[%s1454_s4 + $0x18] sm:$0xff] }
   0xe   :  { %41 = vperm.xlu0 %1113, %v31_v4   ;;  %51 = vperm.xlu1 %1111, %v33_v6   ;;  %v960_v17 = vld [vmem:[#allocation2] sm:$0x1]  ;;  %v911_v18 = vld [vmem:[%s1455_s5 + $0x8] sm:$0xff]  ;;  %v913_v19 = vld [vmem:[%s1455_s5 + $0x18] sm:$0xff]  ;;  %v1274_v25 = vsub.s32 0, %v1271_v22  ;;  %v61_v26 = vsub.s32 2, %v1271_v22 }
   0xf   :  { %v99_v27 = vsub.s32 1, %v1271_v22  ;;  %v103_v28 = vsub.s32 3, %v1271_v22  ;;  %v29_v29 = vld [vmem:[%s1450_s0] sm:$0xf] }
  0x10   :  { %v58_v32 = vrot.slane %v29_v29, %v1274_v25  ;;  %v62_v33 = vrot.slane %v29_v29, %v61_v26  ;;  %v171_v2 = vld [vmem:[%s1453_s3] sm:$0xff] }
  0x11   :  { %v100_v34 = vrot.slane %v29_v29, %v99_v27  ;;  %v104_v35 = vrot.slane %v29_v29, %v103_v28 }
  0x12   :  { %46 = vperm.xlu0 %1113, %v32_v1   ;;  %1114 = vset.pattern.permute.xlu1 %v1172_v3  ;;  %v68_v36 = vrot.slane %v58_v32, %v1274_v25  ;;  %v72_v37 = vrot.slane %v62_v33, %v1274_v25 }
  0x13   :  { %94 = vperm.xlu1 %1114, %v33_v6   ;;  %v110_v40 = vrot.slane %v100_v34, %v99_v27  ;;  %v114_v41 = vrot.slane %v104_v35, %v99_v27  ;;  %v173_v27 = vld [vmem:[%s1453_s3 + $0x10] sm:$0xff] }
  0x14   :  { %v207_v35 = vsel %vm199_vm0, %v173_v27, 0 }
  0x16   :  { %142 = vperm.xlu0 %1113, %v132_v7  }
  0x17   :  { %1115 = vset.pattern.permute.xlu1 %v1173_v5 }
  0x18   :  { %137 = vperm.xlu1 %1115, %v131_v8   ;;  %v201_v8 = vsel %vm199_vm0, %v171_v2, 0 }
  0x1a   :  { %181 = vperm.xlu0 %1113, %v175_v9  }
  0x1c   :  { %147 = vperm.xlu1 %1115, %v133_v10  }
  0x1e   :  { %191 = vperm.xlu0 %1113, %v177_v11  }
  0x20   :  { %152 = vperm.xlu1 %1115, %v134_v12  }
  0x22   :  { %916 = vperm.xlu0 %1113, %v910_v13   ;;  %v172_v13 = vld [vmem:[%s1453_s3 + $0x8] sm:$0xff] }
  0x24   :  { %186 = vperm.xlu1 %1115, %v176_v14  }
  0x26   :  { %926 = vperm.xlu0 %1113, %v912_v15  }
  0x28   :  { %196 = vperm.xlu1 %1115, %v178_v16   ;;  %v1292_v16 = vand.u32 4294901760, %v201_v8 }
  0x2a   :  { %963 = vperm.xlu0 %1113, %v960_v17   ;;  %v1296_v26 = vsub.f32 %v201_v8, %v1292_v16 }
  0x2c   :  { %921 = vperm.xlu1 %1115, %v911_v18  }
  0x30   :  { %931 = vperm.xlu1 %1115, %v913_v19  }
  0x84   :  { %v83_v23 = vpop.permute.xlu1 %82  ;;  %v91_v24 = vpop.permute.xlu0 %90 }
  0x85   :  { %v115_v50 = vmul.f32 %v110_v40, %v83_v23  ;;  %v116_v51 = vmul.f32 %v114_v41, %v83_v23  ;;  %v119_v61 = vmul.f32 %v110_v40, %v91_v24  ;;  %v120_v63 = vmul.f32 %v114_v41, %v91_v24 }
  0x86   :  { %v204_v23 = vsel %vm199_vm0, %v172_v13, 0 }
  0x88   :  { %v87_v30 = vpop.permute.xlu1 %86 }
  0x89   :  { %v37_v31 = vpop.permute.xlu0 %36  ;;  %v117_v47 = vmul.f32 %v110_v40, %v87_v30  ;;  %v118_v48 = vmul.f32 %v114_v41, %v87_v30  ;;  %v1301_v30 = vand.u32 4294901760, %v204_v23 }
  0x8a   :  { %v73_v44 = vmul.f32 %v68_v36, %v37_v31  ;;  %v74_v45 = vmul.f32 %v72_v37, %v37_v31 }
  0x8c   :  { %v123_v55 = vadd.f32 %v115_v50, %v73_v44  ;;  %v124_v56 = vadd.f32 %v116_v51, %v74_v45 }
  0x8d   :  { %v42_v38 = vpop.permute.xlu0 %41  ;;  %v52_v39 = vpop.permute.xlu1 %51 }
  0x8e   :  { %v75_v42 = vmul.f32 %v68_v36, %v42_v38  ;;  %v76_v43 = vmul.f32 %v72_v37, %v42_v38  ;;  %v79_v9 = vmul.f32 %v68_v36, %v52_v39  ;;  %v80_v10 = vmul.f32 %v72_v37, %v52_v39 }
  0x8f   :  { %v287_v38 = vand.u32 4294901760, %v1296_v26 }
  0x90   :  { %v125_v52 = vadd.f32 %v117_v47, %v75_v42  ;;  %v126_v53 = vadd.f32 %v118_v48, %v76_v43  ;;  %v1314_v42 = vsub.f32 %v204_v23, %v1301_v30  ;;  %v174_v43 = vld [vmem:[%s1453_s3 + $0x18] sm:$0xff]  ;;  %v1324_v48 = vand.u32 4294901760, %v207_v35  ;;  %s1176_s3 = smov [#allocation3]  }
  0x91   :  { %v47_v46 = vpop.permute.xlu0 %46  ;;  %s1001_s15 = sshll.u32 %s1176_s3, 4  ;;  %s1002_s15 = int_to_ptr.vmem [resolvable:$true] %s1001_s15 }
  0x92   :  { %v95_v49 = vpop.permute.xlu1 %94  ;;  %v77_v57 = vmul.f32 %v68_v36, %v47_v46  ;;  %v78_v58 = vmul.f32 %v72_v37, %v47_v46  ;;  %s1148_s1 = scalar_lea.vmem %s1002_s15, 32  ;;  %p1153_p1 = scmp.lt.s32.totalorder %s1002_s15, %s1002_s15 }
  0x93   :  { %v121_v3 = vmul.f32 %v110_v40, %v95_v49  ;;  %v122_v4 = vmul.f32 %v114_v41, %v95_v49  ;;  %p1149_p0 = scmp.ne.s32.totalorder %s1002_s15, %s1148_s1  ;;  %p1154_p2 = scmp.lt.s32.totalorder %s1148_s1, %s1148_s1 }
  0x94   :  { %v127_v5 = vadd.f32 %v119_v61, %v77_v57  ;;  %v128_v6 = vadd.f32 %v120_v63, %v78_v58  ;;  %v298_v58 = vand.u32 4294901760, %v1314_v42  ;;  %v1345_v63 = vsub.f32 %v207_v35, %v1324_v48 }
  0x95   :  { %v143_v54 = vpop.permute.xlu0 %142  ;;  %v129_v14 = vadd.f32 %v121_v3, %v79_v9  ;;  %v130_v15 = vadd.f32 %v122_v4, %v80_v10  ;;  %p1155_p3 = por %p1154_p2, %p1153_p1 }
  0x96   :  { %v157_v59 = vadd.f32 %v143_v54, %v125_v52  ;;  %v158_v60 = vadd.f32 %v143_v54, %v126_v53  ;;  %v288_v54 = vsub.f32 %v1296_v26, %v287_v38 }
  0x97   :  { %v138_v62 = vpop.permute.xlu1 %137  ;;  %p1156_p4 = pnand %p1155_p3, %p1149_p0 }
  0x98   :  { %1116 = vtanh.f32 %v157_v59  ;;  %v155_v0 = vadd.f32 %v138_v62, %v123_v55  ;;  %v156_v1 = vadd.f32 %v138_v62, %v124_v56  ;;  %v210_v55 = vsel %vm199_vm0, %v174_v43, 0 }
  0x99   :  { %1118 = vtanh.f32 %v158_v60  ;;  %v1349_v4 = vand.u32 4294901760, %v210_v55 }
  0x9a   :  { %1120 = vtanh.f32 %v155_v0 }
  0x9b   :  { %1122 = vtanh.f32 %v156_v1  ;;  %v148_v7 = vpop.permute.xlu1 %147 }
  0x9c   :  { %v159_v11 = vadd.f32 %v148_v7, %v127_v5  ;;  %v160_v12 = vadd.f32 %v148_v7, %v128_v6  ;;  %v289_v7 = vand.u32 4294901760, %v288_v54 }
  0x9e   :  { %1124 = vtanh.f32 %v159_v11 }
  0x9f   :  { %1126 = vtanh.f32 %v160_v12  ;;  %v153_v17 = vpop.permute.xlu1 %152  ;;  %v299_v12 = vsub.f32 %v1314_v42, %v298_v58 }
  0xa0   :  { %v161_v18 = vadd.f32 %v153_v17, %v129_v14  ;;  %v162_v19 = vadd.f32 %v153_v17, %v130_v15  ;;  %v309_v17 = vand.u32 4294901760, %v1345_v63 }
  0xa2   :  { %v1117_v24 = vpop.eup %1116  ;;  %1128 = vtanh.f32 %v161_v18 }
  0xa3   :  { %v1119_v28 = vpop.eup %1118  ;;  %1130 = vtanh.f32 %v162_v19  ;;  %v218_v29 = vand.u32 4294901760, %v1117_v24 }
  0xa4   :  { %v1121_v31 = vpop.eup %1120  ;;  %v216_v32 = vand.u32 4294901760, %v1119_v28 }
  0xa5   :  { %v1123_v33 = vpop.eup %1122  ;;  %v214_v34 = vand.u32 4294901760, %v1121_v31  ;;  %v1311_v41 = vsub.f32 %v1117_v24, %v218_v29  ;;  %v1368_v24 = vsub.f32 %v210_v55, %v1349_v4 }
  0xa6   :  { %v212_v36 = vand.u32 4294901760, %v1123_v33  ;;  %v1304_v37 = vsub.f32 %v1119_v28, %v216_v32 }
  0xa7   :  { %v1307_v39 = vpack.c.bf16 %v218_v29, %v214_v34  ;;  %v1309_v40 = vsub.f32 %v1121_v31, %v214_v34  ;;  %v349_v57 = vand.u32 4294901760, %v1311_v41  ;;  %v300_v34 = vand.u32 4294901760, %v299_v12 }
  0xa8   :  { %v1125_v44 = vpop.eup %1124  ;;  %v1319_v45 = vpack.c.bf16 %v216_v32, %v212_v36  ;;  %v1321_v46 = vsub.f32 %v1123_v33, %v212_v36  ;;  %v343_v47 = vand.u32 4294901760, %v1304_v37  ;;  %v310_v36 = vsub.f32 %v1345_v63, %v309_v17 }
  0xa9   :  { %v1127_v49 = vpop.eup %1126  ;;  %v222_v50 = vand.u32 4294901760, %v1125_v44  ;;  %v337_v51 = vand.u32 4294901760, %v1309_v40  ;;  %v350_v11 = vsub.f32 %v1311_v41, %v349_v57  ;;  %v320_v54 = vand.u32 4294901760, %v1368_v24 }
  0xaa   :  { %1010 = vmatprep.subr.bf16.mxu1 %v1319_v45  ;;  %1034 = vmatprep.subr.bf16.mxu0 %v1319_v45  ;;  %v220_v52 = vand.u32 4294901760, %v1127_v49  ;;  %v331_v53 = vand.u32 4294901760, %v1321_v46  ;;  %v344_v62 = vsub.f32 %v1304_v37, %v343_v47 }
  0xab   :  { %1012 = vmatpush1.bf16.msra.mxu1 %v1307_v39  ;;  %1036 = vmatpush1.bf16.msra.mxu0 %v1307_v39  ;;  %v1336_v56 = vsub.f32 %v1125_v44, %v222_v50  ;;  %v338_v2 = vsub.f32 %v1309_v40, %v337_v51  ;;  %v351_v32 = vand.u32 4294901760, %v350_v11  ;;  %v1043_v44 = vpack.c.bf16 %v349_v57, %v337_v51 }
  0xac   :  { %v1129_v59 = vpop.eup %1128  ;;  %v1340_v60 = vsub.f32 %v1127_v49, %v220_v52  ;;  %v332_v61 = vsub.f32 %v1321_v46, %v331_v53  ;;  %v345_v15 = vand.u32 4294901760, %v344_v62  ;;  %v1041_v28 = vpack.c.bf16 %v343_v47, %v331_v53 }
  0xad   :  { %v1131_v0 = vpop.eup %1130  ;;  %v226_v1 = vand.u32 4294901760, %v1129_v59  ;;  %v361_v3 = vand.u32 4294901760, %v1336_v56  ;;  %v339_v18 = vand.u32 4294901760, %v338_v2  ;;  %v311_v57 = vand.u32 4294901760, %v310_v36 }
  0xae   :  { %v224_v5 = vand.u32 4294901760, %v1131_v0  ;;  %v333_v6 = vand.u32 4294901760, %v332_v61  ;;  %v355_v8 = vand.u32 4294901760, %v1340_v60  ;;  %v321_v61 = vsub.f32 %v1368_v24, %v320_v54 }
  0xaf   :  { %v1352_v9 = vpack.c.bf16 %v226_v1, %v222_v50  ;;  %v1354_v10 = vsub.f32 %v1129_v59, %v226_v1  ;;  %v362_v19 = vsub.f32 %v1336_v56, %v361_v3  ;;  %v1019_v43 = vpack.c.bf16 %v351_v32, %v339_v18 }
  0xb0   :  { %v1360_v13 = vpack.c.bf16 %v224_v5, %v220_v52  ;;  %v1362_v14 = vsub.f32 %v1131_v0, %v224_v5  ;;  %v1017_v27 = vpack.c.bf16 %v345_v15, %v333_v6  ;;  %v356_v31 = vsub.f32 %v1340_v60, %v355_v8 }
  0xb1   :  { %v373_v23 = vand.u32 4294901760, %v1354_v10  ;;  %v363_v47 = vand.u32 4294901760, %v362_v19  ;;  %v322_v62 = vand.u32 4294901760, %v321_v61 }
  0xb2   :  { %1014 = vmatprep.subr.bf16.mxu1 %v1360_v13  ;;  %1038 = vmatprep.subr.bf16.mxu0 %v1360_v13  ;;  %v367_v29 = vand.u32 4294901760, %v1362_v14  ;;  %v357_v52 = vand.u32 4294901760, %v356_v31 }
  0xb3   :  { %1016 = vmatpush1.bf16.msra.mxu1 %v1352_v9  ;;  %1040 = vmatpush1.bf16.msra.mxu0 %v1352_v9  ;;  %v374_v33 = vsub.f32 %v1354_v10, %v373_v23  ;;  %v1047_v51 = vpack.c.bf16 %v373_v23, %v361_v3 }
  0xb4   :  { %1018 = vmatprep.subr.bf16.mxu1 %v1017_v27  ;;  %1042 = vmatprep.subr.bf16.mxu0 %v1041_v28  ;;  %v368_v35 = vsub.f32 %v1362_v14, %v367_v29  ;;  %v1045_v50 = vpack.c.bf16 %v367_v29, %v355_v8 }
  0xb5   :  { %v375_v49 = vand.u32 4294901760, %v374_v33 }
  0xb6   :  { %290 = vmatmul.mubr.f32.vlgmr.msra.gmra.mrb[0].mxu1 %v289_v7  ;;  %651 = vmatmul.mubr.f32.vlgmr.msra.gmra.mrb[0].mxu0 %v287_v38  ;;  %v369_v53 = vand.u32 4294901760, %v368_v35  ;;  %v1025_v38 = vpack.c.bf16 %v1304_v37, %v1321_v46  ;;  %v1027_v37 = vpack.c.bf16 %v1311_v41, %v1309_v40  ;;  %v1031_v46 = vpack.c.bf16 %v1354_v10, %v1336_v56 }
  0xb7   :  { %1020 = vmatpush1.bf16.msra.mxu1 %v1019_v43  ;;  %1044 = vmatpush1.bf16.msra.mxu0 %v1043_v44  ;;  %v1023_v55 = vpack.c.bf16 %v375_v49, %v363_v47 }
  0xb8   :  { %1046 = vmatprep.subr.bf16.mxu0 %v1045_v50  ;;  %295 = vmatprep.mubr.f32.mxu1 %v1174_v20  ;;  %v1021_v59 = vpack.c.bf16 %v369_v53, %v357_v52 }
  0xb9   :  { %656 = vmatprep.mubr.f32.mxu0 %v1174_v20 }
  0xba   :  { %301 = vmatmul.mubr.f32.gmra.mrb[2].mxu1 %v300_v34  ;;  %1022 = vmatprep.subr.bf16.mxu1 %v1021_v59 }
  0xbb   :  { %660 = vmatmul.mubr.f32.gmra.mrb[2].mxu0 %v298_v58  ;;  %1024 = vmatpush1.bf16.msra.mxu1 %v1023_v55  ;;  %v187_v58 = vpop.permute.xlu1 %186 }
  0xbc   :  { %1048 = vmatpush1.bf16.msra.mxu0 %v1047_v51  ;;  %1026 = vmatprep.subr.bf16.mxu1 %v1025_v38 }
  0xbd   :  { %1050 = vmatprep.subr.bf16.mxu0 %v1319_v45  ;;  %306 = vmatprep.mubr.f32.mxu1 %v1174_v20  ;;  %v1029_v45 = vpack.c.bf16 %v1362_v14, %v1340_v60 }
  0xbe   :  { %665 = vmatprep.mubr.f32.mxu0 %v1174_v20  ;;  %312 = vmatmul.mubr.f32.gmra.mrb[4].mxu1 %v311_v57 }
  0xbf   :  { %669 = vmatmul.mubr.f32.gmra.mrb[4].mxu0 %v309_v17  ;;  %317 = vmatprep.mubr.f32.mxu1 %v1174_v20 }
  0xc0   :  { %674 = vmatprep.mubr.f32.mxu0 %v1174_v20 }
  0xc2   :  { %323 = vmatmul.mubr.f32.gmra.mrb[6].mxu1 %v322_v62 }
  0xc3   :  { %678 = vmatmul.mubr.f32.gmra.mrb[6].mxu0 %v320_v54  ;;  %433 = vmatprep.mubr.f32.mxu1 %v1174_v20 }
  0xc4   :  { %772 = vmatprep.mubr.f32.mxu0 %v1174_v20 }
  0xc6   :  { %435 = vmatmul.mubr.f32.vlgmr.msra.gmra.mrb[0].mxu1 %v1292_v16 }
  0xc7   :  { %1028 = vmatpush1.bf16.msra.mxu1 %v1027_v37  ;;  %774 = vmatmul.mubr.f32.vlgmr.msra.gmra.mrb[0].mxu0 %v1292_v16 }
  0xc8   :  { %1052 = vmatpush1.bf16.msra.mxu0 %v1307_v39  ;;  %1030 = vmatprep.subr.bf16.mxu1 %v1029_v45 }
  0xc9   :  { %1054 = vmatprep.subr.bf16.mxu0 %v1360_v13  ;;  %440 = vmatprep.mubr.f32.mxu1 %v1174_v20  ;;  %v197_v13 = vpop.permute.xlu1 %196 }
  0xca   :  { %779 = vmatprep.mubr.f32.mxu0 %v1174_v20  ;;  %442 = vmatmul.mubr.f32.gmra.mrb[2].mxu1 %v1301_v30 }
  0xcb   :  { %1032 = vmatpush1.bf16.msra.mxu1 %v1031_v46  ;;  %781 = vmatmul.mubr.f32.gmra.mrb[2].mxu0 %v1301_v30 }
  0xcc   :  { %1056 = vmatpush1.bf16.msra.mxu0 %v1352_v9  ;;  %447 = vmatprep.mubr.f32.mxu1 %v1174_v20 }
  0xcd   :  { %786 = vmatprep.mubr.f32.mxu0 %v1174_v20  ;;  %v922_v34 = vpop.permute.xlu1 %921 }
  0xce   :  { %449 = vmatmul.mubr.f32.gmra.mrb[4].mxu1 %v1324_v48 }
  0xcf   :  { %788 = vmatmul.mubr.f32.gmra.mrb[4].mxu0 %v1324_v48  ;;  %454 = vmatprep.mubr.f32.mxu1 %v1174_v20 }
  0xd0   :  { %793 = vmatprep.mubr.f32.mxu0 %v1174_v20 }
  0xd1   :  { %v932_v57 = vpop.permute.xlu1 %931 }
  0xd2   :  { %456 = vmatmul.mubr.f32.gmra.mrb[6].mxu1 %v1349_v4 }
  0xd3   :  { %795 = vmatmul.mubr.f32.gmra.mrb[6].mxu0 %v1349_v4  ;;  %542 = vmatprep.mubr.f32.mxu1 %v1174_v20 }
  0xd4   :  { %873 = vmatprep.mubr.f32.mxu0 %v1174_v20 }
  0xd6   :  { %545 = vmatmul.mubr.f32.vlgmr.msra.gmra.mrb[0].mxu1 %v1296_v26 }
  0xd7   :  { %875 = vmatmul.mubr.f32.vlgmr.msra.gmra.mrb[0].mxu0 %v1292_v16  ;;  %550 = vmatprep.mubr.f32.mxu1 %v1174_v20  ;;  %v182_v16 = vpop.permute.xlu0 %181 }
  0xd8   :  { %880 = vmatprep.mubr.f32.mxu0 %v1174_v20 }
  0xda   :  { %553 = vmatmul.mubr.f32.gmra.mrb[2].mxu1 %v1314_v42 }
  0xdb   :  { %882 = vmatmul.mubr.f32.gmra.mrb[2].mxu0 %v1301_v30  ;;  %558 = vmatprep.mubr.f32.mxu1 %v1174_v20  ;;  %v192_v5 = vpop.permute.xlu0 %191 }
  0xdc   :  { %887 = vmatprep.mubr.f32.mxu0 %v1174_v20 }
  0xde   :  { %561 = vmatmul.mubr.f32.gmra.mrb[4].mxu1 %v1345_v63 }
  0xdf   :  { %889 = vmatmul.mubr.f32.gmra.mrb[4].mxu0 %v1324_v48  ;;  %566 = vmatprep.mubr.f32.mxu1 %v1174_v20  ;;  %v917_v31 = vpop.permute.xlu0 %916 }
  0xe0   :  { %894 = vmatprep.mubr.f32.mxu0 %v1174_v20 }
  0xe2   :  { %569 = vmatmul.mubr.f32.gmra.mrb[6].mxu1 %v1368_v24 }
  0xe3   :  { %896 = vmatmul.mubr.f32.gmra.mrb[6].mxu0 %v1349_v4  ;;  %v927_v52 = vpop.permute.xlu0 %926 }
 0x1a9   :  { %v546_v26 = vpop.f32.mrb[0].mxu1 }
 0x1aa   :  { %v1057_v39 = vadd.f32 %v546_v26, %v182_v16  ;;  %v876_v30 = vpop.f32.mrb[0].mxu0  ;;  %v548_v40 = vpop.f32.mrb[1].mxu1 }
 0x1ab   :  { %v1059_v41 = vadd.f32 %v548_v40, %v182_v16  ;;  %v878_v42 = vpop.f32.mrb[1].mxu0 }
 0x1ac   :  { %v1058_v56 = vadd.f32 %v1057_v39, %v876_v30 }
 0x1ad   :  { %v1060_v60 = vadd.f32 %v1059_v41, %v878_v42  ;;  %v554_v63 = vpop.f32.mrb[2].mxu1 }
 0x1ae   :  { %v1061_v48 = vadd.f32 %v554_v63, %v187_v58  ;;  %v883_v0 = vpop.f32.mrb[2].mxu0  ;;  %v556_v1 = vpop.f32.mrb[3].mxu1  ;;  %1132 = vtanh.f32 %v1058_v56  ;;  %v1175_v56 = vmov 1966171168  }
 0x1af   :  { %v1063_v2 = vadd.f32 %v556_v1, %v187_v58  ;;  %v885_v20 = vpop.f32.mrb[3].mxu0  ;;  %1134 = vtanh.f32 %v1060_v60  ;;  %v976_v58 = vunpack.c.l.s4 %v1175_v56  ;;  %v964_v63 = vpop.permute.xlu0 %963 }
 0x1b0   :  { %v1062_v3 = vadd.f32 %v1061_v48, %v883_v0 }
 0x1b1   :  { %v1064_v4 = vadd.f32 %v1063_v2, %v885_v20  ;;  %v562_v6 = vpop.f32.mrb[4].mxu1  ;;  %v977_v2 = vunpack.c.0.s8 %v976_v58  ;;  %v969_v20 = vrot.slane %v964_v63, %v1274_v25 }
 0x1b2   :  { %1136 = vtanh.f32 %v1062_v3  ;;  %v1065_v7 = vadd.f32 %v562_v6, %v192_v5  ;;  %v890_v8 = vpop.f32.mrb[4].mxu0  ;;  %v564_v9 = vpop.f32.mrb[5].mxu1 }
 0x1b3   :  { %1138 = vtanh.f32 %v1064_v4  ;;  %v1067_v10 = vadd.f32 %v564_v9, %v192_v5  ;;  %v892_v11 = vpop.f32.mrb[5].mxu0 }
 0x1b4   :  { %v1066_v12 = vadd.f32 %v1065_v7, %v890_v8  ;;  %v980_v7 = vsub.s32 %v977_v2, %v1271_v22 }
 0x1b5   :  { %v1068_v14 = vadd.f32 %v1067_v10, %v892_v11  ;;  %v570_v15 = vpop.f32.mrb[6].mxu1 }
 0x1b6   :  { %1140 = vtanh.f32 %v1066_v12  ;;  %v1069_v17 = vadd.f32 %v570_v15, %v197_v13  ;;  %v897_v18 = vpop.f32.mrb[6].mxu0  ;;  %v572_v19 = vpop.f32.mrb[7].mxu1 }
 0x1b7   :  { %1142 = vtanh.f32 %v1068_v14  ;;  %v1071_v23 = vadd.f32 %v572_v19, %v197_v13  ;;  %v899_v24 = vpop.f32.mrb[7].mxu0 }
 0x1b8   :  { %v1070_v27 = vadd.f32 %v1069_v17, %v897_v18  ;;  %v1133_v29 = vpop.eup %1132 }
 0x1b9   :  { %v1072_v28 = vadd.f32 %v1071_v23, %v899_v24  ;;  %v1135_v32 = vpop.eup %1134  ;;  %v934_v36 = vmul.f32 %v1133_v29, %v917_v31 }
 0x1ba   :  { %1144 = vtanh.f32 %v1070_v27  ;;  %v935_v44 = vmul.f32 %v1135_v32, %v917_v31 }
 0x1bb   :  { %1146 = vtanh.f32 %v1072_v28 }
 0x1bc   :  { %v1137_v33 = vpop.eup %1136 }
 0x1bd   :  { %v1139_v35 = vpop.eup %1138  ;;  %v936_v43 = vmul.f32 %v1137_v33, %v922_v34 }
 0x1be   :  { %v937_v47 = vmul.f32 %v1139_v35, %v922_v34 }
 0x1bf   :  { %v942_v49 = vadd.f32 %v936_v43, %v934_v36 }
 0x1c0   :  { %v1141_v50 = vpop.eup %1140  ;;  %v951_v53 = vadd.f32 %v937_v47, %v935_v44 }
 0x1c1   :  { %v1143_v54 = vpop.eup %1142  ;;  %v938_v55 = vmul.f32 %v1141_v50, %v927_v52 }
 0x1c2   :  { %v939_v59 = vmul.f32 %v1143_v54, %v927_v52 }
 0x1c3   :  { %v943_v51 = vadd.f32 %v942_v49, %v938_v55 }
 0x1c4   :  { %v1145_v38 = vpop.eup %1144  ;;  %v952_v61 = vadd.f32 %v951_v53, %v939_v59 }
 0x1c5   :  { %v1147_v62 = vpop.eup %1146  ;;  %v940_v37 = vmul.f32 %v1145_v38, %v932_v57 }
 0x1c6   :  { %v941_v45 = vmul.f32 %v1147_v62, %v932_v57 }
 0x1c7   :  { %v944_v46 = vadd.f32 %v943_v51, %v940_v37 }
 0x1c8   :  { %v953_v16 = vadd.f32 %v952_v61, %v941_v45 }
 0x1c9   :  { %v945_v26 = vrot.slane %v944_v46, 4 }
 0x1ca   :  { %v954_v39 = vrot.slane %v953_v16, 4 }
 0x1cb   :  { %v946_v30 = vadd.f32 %v945_v26, %v944_v46 }
 0x1cc   :  { %v955_v40 = vadd.f32 %v954_v39, %v953_v16 }
 0x1cd   :  { %v947_v41 = vrot.slane %v946_v30, 2 }
 0x1ce   :  { %v956_v42 = vrot.slane %v955_v40, 2 }
 0x1cf   :  { %v948_v60 = vadd.f32 %v947_v41, %v946_v30 }
 0x1d0   :  { %v957_v48 = vadd.f32 %v956_v42, %v955_v40 }
 0x1d1   :  { %v949_v0 = vrot.slane %v948_v60, 1 }
 0x1d2   :  { %v958_v1 = vrot.slane %v957_v48, 1 }
 0x1d3   :  { %v950_v3 = vadd.f32 %v949_v0, %v948_v60 }
 0x1d4   :  { %v959_v5 = vadd.f32 %v958_v1, %v957_v48 }
 0x1d5   :  { %v970_v4 = vadd.f32 %v969_v20, %v950_v3 }
 0x1d6   :  { %v971_v6 = vadd.f32 %v969_v20, %v959_v5 }
 0x1d8   :  { %v974_v8 = vcombine.low %v970_v4, %v971_v6 }
 0x1da   :  { %v981_v9 = vrot.slane %v974_v8, %v980_v7 }
 0x1dc   :  { %v988_v10 = vrot.slane %v981_v9, %v980_v7 }
 0x1de   :  { %994 = vst.msk [vmem:[#allocation3] sm:$0x3] %vm992_vm1, %v988_v10 }
 0x1df   :  { %1159 = shalt.err (!%p1156_p4)
}
 0x1e0   :  { %s1160_s18 = scalar_lea.hbm %s1457_s7, 32 }
 0x1e1   :  { %p1161_p5 = scmp.ne.s32.totalorder %s1457_s7, %s1160_s18  ;;  %p1164_p6 = scmp.lt.u32.totalorder %s1160_s18, %s1457_s7 }
 0x1e3   :  { %p1166_p7 = pnand %p1164_p6, %p1161_p5 }
 0x1e5   :  { %1169 = shalt.err (!%p1166_p7)
}
 0x1e6   :  { %1004 = dma.vmem_to_hbm [thread:$0]  %s1002_s15, 32, %s1457_s7, [#allocation4]  }
 0x1e7   :  { %1170 = dma.done.wait [#allocation4], 32  }
 0x1e8   :  { %1171 = vsyncadd [#allocation4], 4294967264 }
 0x1e9   :  { %1008 = vsyncpa [#allocation4], 1 }

</bundles_post_ra>
